<compile_context>
chip_gen: v7x
topology: tpu7x:2x2x1
jax: 0.10.0
libtpu: 0.0.40
codegen_flags: <defaults>
</compile_context>

<pallas_src>
import jax
import jax.numpy as jnp
from jax.experimental import pallas as pl
from jax.experimental.pallas import tpu as pltpu

LN_EPS = 1e-5
LEAKY_SLOPE = 0.01


def _leaky_relu(x):
    # max(x, slope*x) == LeakyReLU for 0 < slope < 1 (2 VALU ops vs cmp/select/mul).
    return jnp.maximum(x, LEAKY_SLOPE * x)


def _layer_norm_cols(x, gamma, beta):
    # x: (D, tb); normalize over the feature axis (axis 0, sublanes).
    # One-pass statistics: var = E[x^2] - mean^2 (both reductions issue back-to-back).
    d = x.shape[0]
    s = jnp.sum(x, axis=0, keepdims=True)
    sq = jnp.sum(x * x, axis=0, keepdims=True)
    mean = s * (1.0 / d)
    var = sq * (1.0 / d) - mean * mean
    return (x - mean) * jax.lax.rsqrt(var + LN_EPS) * gamma + beta


def agent_kernel(t_ref,                       # SMEM (1,1): Euler step size
                 state_ref, action_ref,       # (tb, state_dim) / (tb, action_dim)
                 w1t_ref, b1_ref, g1_ref, be1_ref,
                 w2t_ref, b2_ref, g2_ref, be2_ref,
                 walt_ref, bal_ref,
                 wl_ref, bl_ref,
                 out_ref):                    # (1, tb)  lane-dense output
    t = t_ref[0, 0]

    # Batch-on-lanes: one XLU transpose per activation tile, then every VPU op and
    # every store runs with the batch on the 128-lane axis.
    state_t = state_ref[...].T                # (state_dim, tb)
    action_t = action_ref[...].T              # (action_dim, tb)

    # Hoist parameter reads once per tile (all VMEM-resident across grid steps).
    w1t, b1, g1, be1 = w1t_ref[...], b1_ref[...], g1_ref[...], be1_ref[...]
    w2t, b2, g2, be2 = w2t_ref[...], b2_ref[...], g2_ref[...], be2_ref[...]
    walt, bal = walt_ref[...], bal_ref[...]
    wl, bl = wl_ref[...], bl_ref[...]         # wl: (action_dim, 1), bl: (1, 1)

    # agent.state_transform : Linear -> LayerNorm -> ReLU        -> (ts, tb)
    h1 = jnp.dot(w1t, state_t, preferred_element_type=jnp.float32) + b1
    s1 = jnp.maximum(_layer_norm_cols(h1, g1, be1), 0.0)

    # inner ExpressiveGradient.state_transform (set_state)       -> (ad, tb)
    h2 = jnp.dot(w2t, s1, preferred_element_type=jnp.float32) + b2
    s2 = jnp.maximum(_layer_norm_cols(h2, g2, be2), 0.0)

    # grad(t=0, action) = LeakyReLU(action_layer(action)) + transformed_state
    a_lin = jnp.dot(walt, action_t, preferred_element_type=jnp.float32) + bal
    g = _leaky_relu(a_lin) + s2

    # one explicit Euler step: y(t) = action + t * grad(0, action)
    y = action_t + t * g

    # outer LeakyReluIM, then last_layer (N=1) as a sublane reduction -> (1, tb)
    z = _leaky_relu(y)
    out_ref[...] = jnp.sum(z * wl, axis=0, keepdims=True) + bl


def _round_up(x, m):
    return ((x + m - 1) // m) * m


def _choose_tile_b(B, tile_b):
    # Small batch: one full-extent block (full-dim blocks bypass the (8,128) rule).
    if B <= 256:
        return B
    # Lane-aligned tile; prefer >= 2 grid steps so the "parallel" batch axis can
    # shard across both v7x TensorCores.
    tile_b = max(128, (int(tile_b) // 128) * 128)
    half = _round_up(pl.cdiv(B, 2), 128)
    return min(tile_b, half)


def expressive_inverse_agent_forward(state, action, params, t, *, tile_b=4096):
    B, state_dim = state.shape
    action_dim = action.shape[1]

    tb = _choose_tile_b(B, tile_b)
    grid = (pl.cdiv(B, tb),)                  # partial last block OK (no jnp.pad pass)

    t_arr = jnp.asarray(t, jnp.float32).reshape(1, 1)

    def resident(arr):
        # Same block every grid step -> stays VMEM-resident across the grid.
        return pl.BlockSpec(arr.shape, lambda i: (0, 0))

    param_order = ("w1t", "b1", "g1", "be1",
                   "w2t", "b2", "g2", "be2",
                   "walt", "bal", "wl", "bl")
    param_args = tuple(params[k] for k in param_order)

    in_specs = [
        pl.BlockSpec((1, 1), lambda i: (0, 0), memory_space=pltpu.MemorySpace.SMEM),
        pl.BlockSpec((tb, state_dim), lambda i: (i, 0)),
        pl.BlockSpec((tb, action_dim), lambda i: (i, 0)),
    ] + [resident(a) for a in param_args]

    out = pl.pallas_call(
        agent_kernel,
        grid=grid,
        out_shape=jax.ShapeDtypeStruct((1, B), jnp.float32),
        in_specs=in_specs,
        out_specs=pl.BlockSpec((1, tb), lambda i: (0, i)),
        compiler_params=pltpu.CompilerParams(
            dimension_semantics=("parallel",)),
    )(t_arr, state, action, *param_args)

    # (1, B) row-major -> (B, 1): pure reshape, no data movement.
    return out.reshape(B, 1)


def init_params(key, state_dim, transformed_state, action_dim):
    ks = jax.random.split(key, 8)

    def lin_t(k, fan_in, fan_out):
        # torch nn.Linear default init; weight stored (out, in), bias stored (out, 1).
        bound = 1.0 / float(fan_in) ** 0.5
        kw, kb = jax.random.split(k)
        w = jax.random.uniform(kw, (fan_out, fan_in), jnp.float32, -bound, bound)
        b = jax.random.uniform(kb, (fan_out, 1), jnp.float32, -bound, bound)
        return w, b

    w1t, b1 = lin_t(ks[0], state_dim, transformed_state)
    w2t, b2 = lin_t(ks[1], transformed_state, action_dim)
    walt, bal = lin_t(ks[2], action_dim, action_dim)
    wlt, bl = lin_t(ks[3], action_dim, 1)
    wl = wlt.T                                              # (action_dim, 1) column
    # LayerNorm affine params (perturbed from identity), stored as (D, 1) columns.
    g1 = 1.0 + 0.1 * jax.random.normal(ks[4], (transformed_state, 1), jnp.float32)
    be1 = 0.1 * jax.random.normal(ks[5], (transformed_state, 1), jnp.float32)
    g2 = 1.0 + 0.1 * jax.random.normal(ks[6], (action_dim, 1), jnp.float32)
    be2 = 0.1 * jax.random.normal(ks[7], (action_dim, 1), jnp.float32)
    return dict(w1t=w1t, b1=b1, g1=g1, be1=be1,
                w2t=w2t, b2=b2, g2=g2, be2=be2,
                walt=walt, bal=bal, wl=wl, bl=bl)


def reference_forward(state, action, p, t):
    # Independent pure-JAX reference in the natural row-major layout
    # (two-pass LayerNorm, where-based LeakyReLU) for cross-validation.
    def ln(x, g, b):
        m = jnp.mean(x, axis=-1, keepdims=True)
        v = jnp.mean((x - m) ** 2, axis=-1, keepdims=True)
        return (x - m) / jnp.sqrt(v + LN_EPS) * g + b

    def leaky(x):
        return jnp.where(x >= 0, x, LEAKY_SLOPE * x)

    h1 = state @ p["w1t"].T + p["b1"].T
    s1 = jnp.maximum(ln(h1, p["g1"].T, p["be1"].T), 0.0)
    h2 = s1 @ p["w2t"].T + p["b2"].T
    s2 = jnp.maximum(ln(h2, p["g2"].T, p["be2"].T), 0.0)
    g = leaky(action @ p["walt"].T + p["bal"].T) + s2
    y = action + t * g
    z = leaky(y)
    return z @ p["wl"] + p["bl"]


if __name__ == "__main__":
    STATE_DIM, TRANSFORMED_STATE, ACTION_DIM, T = 32, 16, 16, 0.1

    key = jax.random.PRNGKey(0)
    k_params, k_data = jax.random.split(key)
    params = init_params(k_params, STATE_DIM, TRANSFORMED_STATE, ACTION_DIM)

    # B=16 exercises the single full-extent block path; B=300 exercises a
    # multi-step grid (grid=(2,), tb=256) with a masked partial last block.
    for B in (16, 300):
        ks, ka = jax.random.split(jax.random.fold_in(k_data, B))
        state = jax.random.normal(ks, (B, STATE_DIM), jnp.float32)
        action = jax.random.normal(ka, (B, ACTION_DIM), jnp.float32)

        out = expressive_inverse_agent_forward(state, action, params, T)
        out = jax.block_until_ready(out)

        ref = reference_forward(state, action, params, T)
        assert out.shape == (B, 1)
        assert jnp.allclose(out, ref, atol=1e-4, rtol=1e-4), f"mismatch vs reference (B={B})"

    print("KERNEL_OK")
</pallas_src>

<mosaic_0001>
module attributes {stable_mosaic.version = 11 : i64} {
  func.func @agent_kernel(%arg0: i32, %arg1: memref<1x1xf32, #tpu.memory_space<smem>>, %arg2: memref<16x32xf32, #tpu.memory_space<vmem>>, %arg3: memref<16x16xf32, #tpu.memory_space<vmem>>, %arg4: memref<16x32xf32, #tpu.memory_space<vmem>>, %arg5: memref<16x1xf32, #tpu.memory_space<vmem>>, %arg6: memref<16x1xf32, #tpu.memory_space<vmem>>, %arg7: memref<16x1xf32, #tpu.memory_space<vmem>>, %arg8: memref<16x16xf32, #tpu.memory_space<vmem>>, %arg9: memref<16x1xf32, #tpu.memory_space<vmem>>, %arg10: memref<16x1xf32, #tpu.memory_space<vmem>>, %arg11: memref<16x1xf32, #tpu.memory_space<vmem>>, %arg12: memref<16x16xf32, #tpu.memory_space<vmem>>, %arg13: memref<16x1xf32, #tpu.memory_space<vmem>>, %arg14: memref<16x1xf32, #tpu.memory_space<vmem>>, %arg15: memref<1x1xf32, #tpu.memory_space<vmem>>, %arg16: memref<1x16xf32, #tpu.memory_space<vmem>>) attributes {dimension_semantics = [#tpu.dimension_semantics<parallel>], iteration_bounds = array<i64: 1>, scalar_prefetch = 0 : i64, scratch_operands = 0 : i64, tpu.core_type = #tpu.core_type<tc>, window_params = [{transform_indices = @transform_0, window_bounds = array<i64: 1, 1>}, {transform_indices = @transform_1, window_bounds = array<i64: 16, 32>}, {transform_indices = @transform_2, window_bounds = array<i64: 16, 16>}, {pipeline_mode = #tpu.pipeline_mode<synchronous>, transform_indices = @transform_3, window_bounds = array<i64: 16, 32>}, {pipeline_mode = #tpu.pipeline_mode<synchronous>, transform_indices = @transform_4, window_bounds = array<i64: 16, 1>}, {pipeline_mode = #tpu.pipeline_mode<synchronous>, transform_indices = @transform_5, window_bounds = array<i64: 16, 1>}, {pipeline_mode = #tpu.pipeline_mode<synchronous>, transform_indices = @transform_6, window_bounds = array<i64: 16, 1>}, {pipeline_mode = #tpu.pipeline_mode<synchronous>, transform_indices = @transform_7, window_bounds = array<i64: 16, 16>}, {pipeline_mode = #tpu.pipeline_mode<synchronous>, transform_indices = @transform_8, window_bounds = array<i64: 16, 1>}, {pipeline_mode = #tpu.pipeline_mode<synchronous>, transform_indices = @transform_9, window_bounds = array<i64: 16, 1>}, {pipeline_mode = #tpu.pipeline_mode<synchronous>, transform_indices = @transform_10, window_bounds = array<i64: 16, 1>}, {pipeline_mode = #tpu.pipeline_mode<synchronous>, transform_indices = @transform_11, window_bounds = array<i64: 16, 16>}, {pipeline_mode = #tpu.pipeline_mode<synchronous>, transform_indices = @transform_12, window_bounds = array<i64: 16, 1>}, {pipeline_mode = #tpu.pipeline_mode<synchronous>, transform_indices = @transform_13, window_bounds = array<i64: 16, 1>}, {pipeline_mode = #tpu.pipeline_mode<synchronous>, transform_indices = @transform_14, window_bounds = array<i64: 1, 1>}, {transform_indices = @transform_15, window_bounds = array<i64: 1, 16>}]} {
    %c0 = arith.constant 0 : index
    %c0_0 = arith.constant 0 : index
    %0 = memref.load %arg1[%c0, %c0_0] : memref<1x1xf32, #tpu.memory_space<smem>>
    %c0_1 = arith.constant 0 : index
    %c0_2 = arith.constant 0 : index
    %1 = vector.load %arg2[%c0_1, %c0_2] : memref<16x32xf32, #tpu.memory_space<vmem>>, vector<16x32xf32>
    %2 = tpu.transpose %1, [1, 0] : vector<16x32xf32> -> vector<32x16xf32>
    %c0_3 = arith.constant 0 : index
    %c0_4 = arith.constant 0 : index
    %3 = vector.load %arg3[%c0_3, %c0_4] : memref<16x16xf32, #tpu.memory_space<vmem>>, vector<16x16xf32>
    %4 = tpu.transpose %3, [1, 0] : vector<16x16xf32> -> vector<16x16xf32>
    %c0_5 = arith.constant 0 : index
    %c0_6 = arith.constant 0 : index
    %5 = vector.load %arg4[%c0_5, %c0_6] : memref<16x32xf32, #tpu.memory_space<vmem>>, vector<16x32xf32>
    %c0_7 = arith.constant 0 : index
    %c0_8 = arith.constant 0 : index
    %6 = vector.load %arg5[%c0_7, %c0_8] : memref<16x1xf32, #tpu.memory_space<vmem>>, vector<16x1xf32>
    %c0_9 = arith.constant 0 : index
    %c0_10 = arith.constant 0 : index
    %7 = vector.load %arg6[%c0_9, %c0_10] : memref<16x1xf32, #tpu.memory_space<vmem>>, vector<16x1xf32>
    %c0_11 = arith.constant 0 : index
    %c0_12 = arith.constant 0 : index
    %8 = vector.load %arg7[%c0_11, %c0_12] : memref<16x1xf32, #tpu.memory_space<vmem>>, vector<16x1xf32>
    %c0_13 = arith.constant 0 : index
    %c0_14 = arith.constant 0 : index
    %9 = vector.load %arg8[%c0_13, %c0_14] : memref<16x16xf32, #tpu.memory_space<vmem>>, vector<16x16xf32>
    %c0_15 = arith.constant 0 : index
    %c0_16 = arith.constant 0 : index
    %10 = vector.load %arg9[%c0_15, %c0_16] : memref<16x1xf32, #tpu.memory_space<vmem>>, vector<16x1xf32>
    %c0_17 = arith.constant 0 : index
    %c0_18 = arith.constant 0 : index
    %11 = vector.load %arg10[%c0_17, %c0_18] : memref<16x1xf32, #tpu.memory_space<vmem>>, vector<16x1xf32>
    %c0_19 = arith.constant 0 : index
    %c0_20 = arith.constant 0 : index
    %12 = vector.load %arg11[%c0_19, %c0_20] : memref<16x1xf32, #tpu.memory_space<vmem>>, vector<16x1xf32>
    %c0_21 = arith.constant 0 : index
    %c0_22 = arith.constant 0 : index
    %13 = vector.load %arg12[%c0_21, %c0_22] : memref<16x16xf32, #tpu.memory_space<vmem>>, vector<16x16xf32>
    %c0_23 = arith.constant 0 : index
    %c0_24 = arith.constant 0 : index
    %14 = vector.load %arg13[%c0_23, %c0_24] : memref<16x1xf32, #tpu.memory_space<vmem>>, vector<16x1xf32>
    %c0_25 = arith.constant 0 : index
    %c0_26 = arith.constant 0 : index
    %15 = vector.load %arg14[%c0_25, %c0_26] : memref<16x1xf32, #tpu.memory_space<vmem>>, vector<16x1xf32>
    %c0_27 = arith.constant 0 : index
    %c0_28 = arith.constant 0 : index
    %16 = vector.load %arg15[%c0_27, %c0_28] : memref<1x1xf32, #tpu.memory_space<vmem>>, vector<1x1xf32>
    %cst = arith.constant dense<0.000000e+00> : vector<16x16xf32>
    %17 = tpu.matmul %5, %2, %cst {dimension_numbers = #tpu.dot_dimension_numbers<[1], [0], [0], [1], [0, 0, 1, 1], [], []>} : vector<16x32xf32>, vector<32x16xf32>, vector<16x16xf32> -> vector<16x16xf32>
    %18 = vector.broadcast %6 : vector<16x1xf32> to vector<16x16xf32>
    %19 = arith.addf %17, %18 : vector<16x16xf32>
    %cst_29 = arith.constant dense<0.000000e+00> : vector<16xf32>
    %20 = vector.multi_reduction <add>, %19, %cst_29 [0] : vector<16x16xf32> to vector<16xf32>
    %21 = vector.shape_cast %20 : vector<16xf32> to vector<1x16xf32>
    %22 = arith.mulf %19, %19 : vector<16x16xf32>
    %cst_30 = arith.constant dense<0.000000e+00> : vector<16xf32>
    %23 = vector.multi_reduction <add>, %22, %cst_30 [0] : vector<16x16xf32> to vector<16xf32>
    %24 = vector.shape_cast %23 : vector<16xf32> to vector<1x16xf32>
    %cst_31 = arith.constant 6.250000e-02 : f32
    %25 = vector.broadcast %cst_31 : f32 to vector<1x16xf32>
    %26 = arith.mulf %21, %25 : vector<1x16xf32>
    %cst_32 = arith.constant 6.250000e-02 : f32
    %27 = vector.broadcast %cst_32 : f32 to vector<1x16xf32>
    %28 = arith.mulf %24, %27 : vector<1x16xf32>
    %29 = arith.mulf %26, %26 : vector<1x16xf32>
    %30 = arith.subf %28, %29 : vector<1x16xf32>
    %31 = vector.broadcast %26 : vector<1x16xf32> to vector<16x16xf32>
    %32 = arith.subf %19, %31 : vector<16x16xf32>
    %cst_33 = arith.constant 9.99999974E-6 : f32
    %33 = vector.broadcast %cst_33 : f32 to vector<1x16xf32>
    %34 = arith.addf %30, %33 : vector<1x16xf32>
    %35 = math.rsqrt %34 : vector<1x16xf32>
    %36 = vector.broadcast %35 : vector<1x16xf32> to vector<16x16xf32>
    %37 = arith.mulf %32, %36 : vector<16x16xf32>
    %38 = vector.broadcast %7 : vector<16x1xf32> to vector<16x16xf32>
    %39 = arith.mulf %37, %38 : vector<16x16xf32>
    %40 = vector.broadcast %8 : vector<16x1xf32> to vector<16x16xf32>
    %41 = arith.addf %39, %40 : vector<16x16xf32>
    %cst_34 = arith.constant 0.000000e+00 : f32
    %42 = vector.broadcast %cst_34 : f32 to vector<16x16xf32>
    %43 = arith.maximumf %41, %42 : vector<16x16xf32>
    %cst_35 = arith.constant dense<0.000000e+00> : vector<16x16xf32>
    %44 = tpu.matmul %9, %43, %cst_35 {dimension_numbers = #tpu.dot_dimension_numbers<[1], [0], [0], [1], [0, 0, 1, 1], [], []>} : vector<16x16xf32>, vector<16x16xf32>, vector<16x16xf32> -> vector<16x16xf32>
    %45 = vector.broadcast %10 : vector<16x1xf32> to vector<16x16xf32>
    %46 = arith.addf %44, %45 : vector<16x16xf32>
    %cst_36 = arith.constant dense<0.000000e+00> : vector<16xf32>
    %47 = vector.multi_reduction <add>, %46, %cst_36 [0] : vector<16x16xf32> to vector<16xf32>
    %48 = vector.shape_cast %47 : vector<16xf32> to vector<1x16xf32>
    %49 = arith.mulf %46, %46 : vector<16x16xf32>
    %cst_37 = arith.constant dense<0.000000e+00> : vector<16xf32>
    %50 = vector.multi_reduction <add>, %49, %cst_37 [0] : vector<16x16xf32> to vector<16xf32>
    %51 = vector.shape_cast %50 : vector<16xf32> to vector<1x16xf32>
    %cst_38 = arith.constant 6.250000e-02 : f32
    %52 = vector.broadcast %cst_38 : f32 to vector<1x16xf32>
    %53 = arith.mulf %48, %52 : vector<1x16xf32>
    %cst_39 = arith.constant 6.250000e-02 : f32
    %54 = vector.broadcast %cst_39 : f32 to vector<1x16xf32>
    %55 = arith.mulf %51, %54 : vector<1x16xf32>
    %56 = arith.mulf %53, %53 : vector<1x16xf32>
    %57 = arith.subf %55, %56 : vector<1x16xf32>
    %58 = vector.broadcast %53 : vector<1x16xf32> to vector<16x16xf32>
    %59 = arith.subf %46, %58 : vector<16x16xf32>
    %cst_40 = arith.constant 9.99999974E-6 : f32
    %60 = vector.broadcast %cst_40 : f32 to vector<1x16xf32>
    %61 = arith.addf %57, %60 : vector<1x16xf32>
    %62 = math.rsqrt %61 : vector<1x16xf32>
    %63 = vector.broadcast %62 : vector<1x16xf32> to vector<16x16xf32>
    %64 = arith.mulf %59, %63 : vector<16x16xf32>
    %65 = vector.broadcast %11 : vector<16x1xf32> to vector<16x16xf32>
    %66 = arith.mulf %64, %65 : vector<16x16xf32>
    %67 = vector.broadcast %12 : vector<16x1xf32> to vector<16x16xf32>
    %68 = arith.addf %66, %67 : vector<16x16xf32>
    %cst_41 = arith.constant 0.000000e+00 : f32
    %69 = vector.broadcast %cst_41 : f32 to vector<16x16xf32>
    %70 = arith.maximumf %68, %69 : vector<16x16xf32>
    %cst_42 = arith.constant dense<0.000000e+00> : vector<16x16xf32>
    %71 = tpu.matmul %13, %4, %cst_42 {dimension_numbers = #tpu.dot_dimension_numbers<[1], [0], [0], [1], [0, 0, 1, 1], [], []>} : vector<16x16xf32>, vector<16x16xf32>, vector<16x16xf32> -> vector<16x16xf32>
    %72 = vector.broadcast %14 : vector<16x1xf32> to vector<16x16xf32>
    %73 = arith.addf %71, %72 : vector<16x16xf32>
    %cst_43 = arith.constant 0.00999999977 : f32
    %74 = vector.broadcast %cst_43 : f32 to vector<16x16xf32>
    %75 = arith.mulf %74, %73 : vector<16x16xf32>
    %76 = arith.maximumf %73, %75 : vector<16x16xf32>
    %77 = arith.addf %76, %70 : vector<16x16xf32>
    %78 = vector.broadcast %0 : f32 to vector<16x16xf32>
    %79 = arith.mulf %78, %77 : vector<16x16xf32>
    %80 = arith.addf %4, %79 : vector<16x16xf32>
    %cst_44 = arith.constant 0.00999999977 : f32
    %81 = vector.broadcast %cst_44 : f32 to vector<16x16xf32>
    %82 = arith.mulf %81, %80 : vector<16x16xf32>
    %83 = arith.maximumf %80, %82 : vector<16x16xf32>
    %84 = vector.broadcast %15 : vector<16x1xf32> to vector<16x16xf32>
    %85 = arith.mulf %83, %84 : vector<16x16xf32>
    %cst_45 = arith.constant dense<0.000000e+00> : vector<16xf32>
    %86 = vector.multi_reduction <add>, %85, %cst_45 [0] : vector<16x16xf32> to vector<16xf32>
    %87 = vector.shape_cast %86 : vector<16xf32> to vector<1x16xf32>
    %88 = vector.broadcast %16 : vector<1x1xf32> to vector<1x16xf32>
    %89 = arith.addf %87, %88 : vector<1x16xf32>
    %c0_46 = arith.constant 0 : index
    %c0_47 = arith.constant 0 : index
    %90 = vector.load %arg16[%c0_46, %c0_47] : memref<1x16xf32, #tpu.memory_space<vmem>>, vector<1x16xf32>
    tpu.vector_store %arg16[%c0_46, %c0_47], %89 {strides = array<i32>} : memref<1x16xf32, #tpu.memory_space<vmem>>, vector<1x16xf32>,
    return
  }
  func.func @transform_0(%arg0: i32) -> (i32, i32) {
    %c0_i32 = arith.constant 0 : i32
    %c0_i32_0 = arith.constant 0 : i32
    %c0_i32_1 = arith.constant 0 : i32
    return %c0_i32, %c0_i32_0 : i32, i32
  }
  func.func @transform_1(%arg0: i32) -> (i32, i32) {
    %c0_i32 = arith.constant 0 : i32
    %c0_i32_0 = arith.constant 0 : i32
    return %arg0, %c0_i32 : i32, i32
  }
  func.func @transform_2(%arg0: i32) -> (i32, i32) {
    %c0_i32 = arith.constant 0 : i32
    %c0_i32_0 = arith.constant 0 : i32
    return %arg0, %c0_i32 : i32, i32
  }
  func.func @transform_3(%arg0: i32) -> (i32, i32) {
    %c0_i32 = arith.constant 0 : i32
    %c0_i32_0 = arith.constant 0 : i32
    %c0_i32_1 = arith.constant 0 : i32
    return %c0_i32, %c0_i32_0 : i32, i32
  }
  func.func @transform_4(%arg0: i32) -> (i32, i32) {
    %c0_i32 = arith.constant 0 : i32
    %c0_i32_0 = arith.constant 0 : i32
    %c0_i32_1 = arith.constant 0 : i32
    return %c0_i32, %c0_i32_0 : i32, i32
  }
  func.func @transform_5(%arg0: i32) -> (i32, i32) {
    %c0_i32 = arith.constant 0 : i32
    %c0_i32_0 = arith.constant 0 : i32
    %c0_i32_1 = arith.constant 0 : i32
    return %c0_i32, %c0_i32_0 : i32, i32
  }
  func.func @transform_6(%arg0: i32) -> (i32, i32) {
    %c0_i32 = arith.constant 0 : i32
    %c0_i32_0 = arith.constant 0 : i32
    %c0_i32_1 = arith.constant 0 : i32
    return %c0_i32, %c0_i32_0 : i32, i32
  }
  func.func @transform_7(%arg0: i32) -> (i32, i32) {
    %c0_i32 = arith.constant 0 : i32
    %c0_i32_0 = arith.constant 0 : i32
    %c0_i32_1 = arith.constant 0 : i32
    return %c0_i32, %c0_i32_0 : i32, i32
  }
  func.func @transform_8(%arg0: i32) -> (i32, i32) {
    %c0_i32 = arith.constant 0 : i32
    %c0_i32_0 = arith.constant 0 : i32
    %c0_i32_1 = arith.constant 0 : i32
    return %c0_i32, %c0_i32_0 : i32, i32
  }
  func.func @transform_9(%arg0: i32) -> (i32, i32) {
    %c0_i32 = arith.constant 0 : i32
    %c0_i32_0 = arith.constant 0 : i32
    %c0_i32_1 = arith.constant 0 : i32
    return %c0_i32, %c0_i32_0 : i32, i32
  }
  func.func @transform_10(%arg0: i32) -> (i32, i32) {
    %c0_i32 = arith.constant 0 : i32
    %c0_i32_0 = arith.constant 0 : i32
    %c0_i32_1 = arith.constant 0 : i32
    return %c0_i32, %c0_i32_0 : i32, i32
  }
  func.func @transform_11(%arg0: i32) -> (i32, i32) {
    %c0_i32 = arith.constant 0 : i32
    %c0_i32_0 = arith.constant 0 : i32
    %c0_i32_1 = arith.constant 0 : i32
    return %c0_i32, %c0_i32_0 : i32, i32
  }
  func.func @transform_12(%arg0: i32) -> (i32, i32) {
    %c0_i32 = arith.constant 0 : i32
    %c0_i32_0 = arith.constant 0 : i32
    %c0_i32_1 = arith.constant 0 : i32
    return %c0_i32, %c0_i32_0 : i32, i32
  }
  func.func @transform_13(%arg0: i32) -> (i32, i32) {
    %c0_i32 = arith.constant 0 : i32
    %c0_i32_0 = arith.constant 0 : i32
    %c0_i32_1 = arith.constant 0 : i32
    return %c0_i32, %c0_i32_0 : i32, i32
  }
  func.func @transform_14(%arg0: i32) -> (i32, i32) {
    %c0_i32 = arith.constant 0 : i32
    %c0_i32_0 = arith.constant 0 : i32
    %c0_i32_1 = arith.constant 0 : i32
    return %c0_i32, %c0_i32_0 : i32, i32
  }
  func.func @transform_15(%arg0: i32) -> (i32, i32) {
    %c0_i32 = arith.constant 0 : i32
    %c0_i32_0 = arith.constant 0 : i32
    return %c0_i32, %arg0 : i32, i32
  }
}

</mosaic_0001>

<bundles_post_ra>
// kernel: tpu_custom_call.1
= control target key start
LH: loop header
LB: loop body
LE: loop exit
PB: predicated region body
PF: predicated region fallthrough
CT: control target
= control target key end

     0   :  { %s861_s0 = inlined_call_operand.<no memory space> [shape: f32[1,1], index: 0, kind: input, shape index: {}]   ;;  %s862_s1 = inlined_call_operand.vmem [shape: f32[16,32], index: 1, kind: input, shape index: {}]   ;;  %s863_s2 = inlined_call_operand.vmem [shape: f32[16,16], index: 2, kind: input, shape index: {}]   ;;  %s864_s3 = inlined_call_operand.vmem [shape: f32[16,32], index: 3, kind: input, shape index: {}]   ;;  %s865_s4 = inlined_call_operand.vmem [shape: f32[16,1], index: 4, kind: input, shape index: {}]   ;;  %s866_s5 = inlined_call_operand.vmem [shape: f32[16,1], index: 5, kind: input, shape index: {}]   ;;  %s867_s6 = inlined_call_operand.vmem [shape: f32[16,1], index: 6, kind: input, shape index: {}]   ;;  %s868_s7 = inlined_call_operand.vmem [shape: f32[16,16], index: 7, kind: input, shape index: {}]   ;;  %s869_s8 = inlined_call_operand.vmem [shape: f32[16,1], index: 8, kind: input, shape index: {}]   ;;  %s870_s9 = inlined_call_operand.vmem [shape: f32[16,1], index: 9, kind: input, shape index: {}]   ;;  %s871_s10 = inlined_call_operand.vmem [shape: f32[16,1], index: 10, kind: input, shape index: {}]   ;;  %s872_s11 = inlined_call_operand.vmem [shape: f32[16,16], index: 11, kind: input, shape index: {}]   ;;  %s873_s12 = inlined_call_operand.vmem [shape: f32[16,1], index: 12, kind: input, shape index: {}]   ;;  %s874_s13 = inlined_call_operand.vmem [shape: f32[16,1], index: 13, kind: input, shape index: {}]   ;;  %s875_s14 = inlined_call_operand.<no memory space> [shape: f32[1,1], index: 14, kind: input, shape index: {}]   ;;  %s876_s15 = inlined_call_operand.hbm [shape: f32[1,16], index: 15, kind: output, shape index: {}]  }
   0x1   :  { %v21_v0 = vstv %s875_s14 }
   0x2   :  { %22 = vst [vmem:[#allocation3] sm:$0x1] %v21_v0 }
   0x3   :  { %v55_v1 = vld [vmem:[%s862_s1] sm:$0xff]  ;;  %v56_v2 = vld [vmem:[%s862_s1 + $0x8] sm:$0xff]  ;;  %vm124_vm0 = vcmask 261120   ;;  %v657_v5 = vmov 0  }
   0x4   :  { %v93_v3 = vld [vmem:[%s865_s4] sm:$0xff]  ;;  %v610_v4 = vpack.c.bf16 %v56_v2, %v55_v1  ;;  %vm611_vm1 = vmpackc.low %vm124_vm0, %vm124_vm0  ;;  %627 = vset.pattern.permute.xlu0 %v657_v5  ;;  %628 = vset.pattern.permute.xlu1 %v657_v5  ;;  %v94_v7 = vld [vmem:[%s865_s4 + $0x8] sm:$0xff] }
   0x5   :  { %v91_v6 = vld [vmem:[%s864_s3] sm:$0xff]  ;;  %116 = vperm.xlu0 %627, %v93_v3   ;;  %v96_v9 = vld [vmem:[%s866_s5 + $0x8] sm:$0xff] }
   0x6   :  { %593 = vmatprep.mubr.msk.f32.mxu0 %vm124_vm0, %v91_v6  ;;  %612 = vmatprep.subr.msk.bf16.mxu0 %vm611_vm1, %v610_v4  ;;  %v95_v8 = vld [vmem:[%s866_s5] sm:$0xff]  ;;  %v92_v11 = vld [vmem:[%s864_s3 + $0x8] sm:$0xff] }
   0x7   :  { %615 = vmatpush3.bf16.xpose.msk.msra.mxu0 %vm611_vm1, %v610_v4  ;;  %245 = vperm.xlu1 %628, %v95_v8   ;;  %v97_v10 = vld [vmem:[%s867_s6] sm:$0xff] }
   0x9   :  { %121 = vperm.xlu0 %627, %v94_v7  }
   0xb   :  { %250 = vperm.xlu1 %628, %v96_v9  }
   0xc   :  { %23 = vsyncpa [#allocation5], 0  ;;  %v98_v12 = vld [vmem:[%s867_s6 + $0x8] sm:$0xff]  ;;  %v101_v13 = vld [vmem:[%s869_s8] sm:$0xff]  ;;  %vm212_vm2 = vcmask 130048   ;;  %vm553_vm3 = vcmask 122880  }
   0xd   :  { %257 = vperm.xlu0 %627, %v97_v10   ;;  %v102_v14 = vld [vmem:[%s869_s8 + $0x8] sm:$0xff]  ;;  %v103_v15 = vld [vmem:[%s870_s9] sm:$0xff] }
   0xe   :  { %594 = vmatmul.mubr.msk.f32.vlgmr.msra.gmra.mrb[0].mxu0 %vm124_vm0, %v92_v11  ;;  %v104_v16 = vld [vmem:[%s870_s9 + $0x8] sm:$0xff]  ;;  %v109_v17 = vld [vmem:[%s873_s12] sm:$0xff] }
   0xf   :  { %262 = vperm.xlu1 %628, %v98_v12   ;;  %v110_v18 = vld [vmem:[%s873_s12 + $0x8] sm:$0xff]  ;;  %v57_v19 = vld [vmem:[%s863_s2] sm:$0xff] }
  0x10   :  { %v105_v20 = vld [vmem:[%s871_s10] sm:$0xff]  ;;  %v58_v21 = vld [vmem:[%s863_s2 + $0x8] sm:$0xff] }
  0x11   :  { %v106_v22 = vld [vmem:[%s871_s10 + $0x8] sm:$0xff]  ;;  %v111_v23 = vld [vmem:[%s874_s13] sm:$0xff] }
  0x12   :  { %v113_v24 = vld [vmem:[#allocation3] sm:$0x1]  ;;  %v112_v25 = vld [vmem:[%s874_s13 + $0x8] sm:$0xff] }
  0x13   :  { %271 = vperm.xlu1 %628, %v101_v13   ;;  %v99_v26 = vld [vmem:[%s868_s7] sm:$0xff]  ;;  %v100_v13 = vld [vmem:[%s868_s7 + $0x8] sm:$0xff] }
  0x14   :  { %600 = vmatprep.mubr.msk.f32.mxu1 %vm212_vm2, %v99_v26 }
  0x17   :  { %276 = vperm.xlu1 %628, %v102_v14   ;;  %v107_v14 = vld [vmem:[%s872_s11] sm:$0xff] }
  0x1b   :  { %392 = vperm.xlu1 %628, %v103_v15   ;;  %v108_v15 = vld [vmem:[%s872_s11 + $0x8] sm:$0xff] }
  0x1f   :  { %397 = vperm.xlu1 %628, %v104_v16  }
  0x23   :  { %418 = vperm.xlu1 %628, %v109_v17  }
  0x27   :  { %423 = vperm.xlu1 %628, %v110_v18  }
  0x2b   :  { %59 = vxpose.xlu0.b32.start [1/2] (short) (narrow) %v57_v19, 16  ;;  %404 = vperm.xlu1 %628, %v105_v20  }
  0x2f   :  { %60 = vxpose.xlu0.b32.end [2/2] (short) (narrow) %v58_v21, 16  ;;  %409 = vperm.xlu1 %628, %v106_v22  }
  0x33   :  { %524 = vperm.xlu1 %628, %v111_v23  }
  0x37   :  { %545 = vperm.xlu1 %628, %v113_v24  }
  0x58   :  { %529 = vperm.xlu0 %627, %v112_v25  }
  0x84   :  { %v117_v27 = vpop.permute.xlu0 %116 }
  0x86   :  { %v246_v60 = vpop.permute.xlu1 %245 }
  0x88   :  { %v122_v28 = vpop.permute.xlu0 %121 }
  0x8a   :  { %v251_v62 = vpop.permute.xlu1 %250 }
  0x8c   :  { %v258_v61 = vpop.permute.xlu0 %257 }
  0x8e   :  { %v263_v5 = vpop.permute.xlu1 %262 }
  0x92   :  { %v272_v16 = vpop.permute.xlu1 %271 }
  0x96   :  { %v277_v17 = vpop.permute.xlu1 %276 }
  0xab   :  { %v820_v2 = vpop.trf.xlu0 }
  0xaf   :  { %v822_v10 = vpop.trf.xlu0 }
  0xb0   :  { %v620_v11 = vpack.c.bf16 %v822_v10, %v820_v2 }
  0xe1   :  { %v595_v29 = vpop.f32.mrb[0].mxu0 }
  0xe2   :  { %v209_v30 = vadd.f32 %v595_v29, %v122_v28  ;;  %v203_v31 = vpop.f32.mrb[1].mxu0 }
  0xe3   :  { %v204_v32 = vadd.f32 %v203_v31, %v117_v27 }
  0xe4   :  { %v214_v33 = vsel %vm212_vm2, %v209_v30, 0.0  ;;  %v223_v34 = vmul.f32 %v209_v30, %v209_v30 }
  0xe5   :  { %v213_v35 = vsel %vm212_vm2, %v204_v32, 0.0  ;;  %v222_v36 = vmul.f32 %v204_v32, %v204_v32 }
  0xe6   :  { %v225_v37 = vsel %vm212_vm2, %v223_v34, 0.0  ;;  %v215_v38 = vadd.f32 %v214_v33, %v213_v35  ;;  %v393_v35 = vpop.permute.xlu1 %392 }
  0xe7   :  { %v224_v39 = vsel %vm212_vm2, %v222_v36, 0.0 }
  0xe8   :  { %v216_v40 = vrot.slane %v215_v38, 4  ;;  %v226_v41 = vadd.f32 %v225_v37, %v224_v39 }
  0xea   :  { %v217_v42 = vadd.f32 %v216_v40, %v215_v38  ;;  %v227_v43 = vrot.slane %v226_v41, 4 }
  0xec   :  { %v218_v44 = vrot.slane %v217_v42, 2  ;;  %v228_v45 = vadd.f32 %v227_v43, %v226_v41 }
  0xee   :  { %v219_v46 = vadd.f32 %v218_v44, %v217_v42  ;;  %v229_v47 = vrot.slane %v228_v45, 2  ;;  %v398_v42 = vpop.permute.xlu1 %397 }
  0xf0   :  { %v220_v48 = vrot.slane %v219_v46, 1  ;;  %v230_v49 = vadd.f32 %v229_v47, %v228_v45 }
  0xf2   :  { %v221_v50 = vadd.f32 %v220_v48, %v219_v46  ;;  %v231_v51 = vrot.slane %v230_v49, 1 }
  0xf4   :  { %v232_v52 = vadd.f32 %v231_v51, %v230_v49  ;;  %v233_v53 = vmul.f32 0.0625, %v221_v50  ;;  %v419_v51 = vpop.permute.xlu1 %418 }
  0xf6   :  { %v234_v54 = vmul.f32 0.0625, %v232_v52  ;;  %v235_v55 = vmul.f32 %v233_v53, %v233_v53  ;;  %v237_v56 = vsub.f32 %v204_v32, %v233_v53  ;;  %v238_v57 = vsub.f32 %v209_v30, %v233_v53 }
  0xf8   :  { %v236_v58 = vsub.f32 %v234_v54, %v235_v55  ;;  %v424_v54 = vpop.permute.xlu1 %423 }
  0xfa   :  { %v239_v59 = vadd.f32 1e-05, %v236_v58 }
  0xfc   :  { %629 = vrsqrt.f32 %v239_v59  ;;  %v405_v55 = vpop.permute.xlu1 %404 }
 0x106   :  { %v630_v63 = vpop.eup %629 }
 0x107   :  { %v241_v0 = vmul.f32 %v630_v63, %v237_v56  ;;  %v242_v1 = vmul.f32 %v630_v63, %v238_v57 }
 0x109   :  { %v253_v3 = vmul.f32 %v246_v60, %v241_v0  ;;  %v254_v4 = vmul.f32 %v251_v62, %v242_v1  ;;  %v410_v1 = vpop.permute.xlu1 %409 }
 0x10b   :  { %v265_v6 = vadd.f32 %v258_v61, %v253_v3  ;;  %v266_v7 = vadd.f32 %v263_v5, %v254_v4 }
 0x10d   :  { %v267_v8 = vmax.f32 %v265_v6, 0.0  ;;  %v268_v9 = vmax.f32 %v266_v7, 0.0 }
 0x10f   :  { %v616_v12 = vpack.c.bf16 %v268_v9, %v267_v8  ;;  %v513_v9 = vstv %s861_s0  ;;  %s658_s0 = smov [#allocation4]  }
 0x110   :  { %s561_s25 = sshll.u32 %s658_s0, 4  ;;  %s562_s25 = int_to_ptr.vmem [resolvable:$true] %s561_s25 }
 0x111   :  { %617 = vmatprep.subr.bf16.mxu1 %v616_v12  ;;  %s633_s6 = scalar_lea.vmem %s562_s25, 16  ;;  %s637_s14 = scalar_lea.vmem %s562_s25, 32 }
 0x112   :  { %619 = vmatpush3.bf16.msra.mxu1 %v616_v12  ;;  %p634_p0 = scmp.ne.s32.totalorder %s562_s25, %s633_s6  ;;  %p638_p1 = scmp.lt.s32.totalorder %s562_s25, %s562_s25 }
 0x113   :  { %621 = vmatprep.subr.bf16.mxu1 %v620_v11  ;;  %p639_p2 = scmp.lt.s32.totalorder %s637_s14, %s633_s6 }
 0x115   :  { %601 = vmatmul.mubr.msk.f32.vlgmr.msra.gmra.mrb[0].mxu1 %vm212_vm2, %v100_v13  ;;  %p640_p3 = por %p639_p2, %p638_p1 }
 0x116   :  { %623 = vmatpush3.bf16.msra.mxu1 %v620_v11  ;;  %607 = vmatprep.mubr.msk.f32.mxu1 %vm212_vm2, %v107_v14 }
 0x117   :  { %p641_p4 = pnand %p640_p3, %p634_p0 }
 0x119   :  { %608 = vmatmul.mubr.msk.f32.vlgmr.msra.gmra.mrb[2].mxu1 %vm212_vm2, %v108_v15 }
 0x1e8   :  { %v602_v18 = vpop.f32.mrb[0].mxu1 }
 0x1e9   :  { %v357_v19 = vadd.f32 %v602_v18, %v277_v17  ;;  %v351_v20 = vpop.f32.mrb[1].mxu1 }
 0x1ea   :  { %v352_v21 = vadd.f32 %v351_v20, %v272_v16 }
 0x1eb   :  { %v361_v22 = vsel %vm212_vm2, %v357_v19, 0.0  ;;  %v370_v23 = vmul.f32 %v357_v19, %v357_v19 }
 0x1ec   :  { %v360_v24 = vsel %vm212_vm2, %v352_v21, 0.0  ;;  %v369_v25 = vmul.f32 %v352_v21, %v352_v21  ;;  %v609_v26 = vpop.f32.mrb[2].mxu1 }
 0x1ed   :  { %v372_v27 = vsel %vm212_vm2, %v370_v23, 0.0  ;;  %v362_v28 = vadd.f32 %v361_v22, %v360_v24  ;;  %v498_v29 = vpop.f32.mrb[3].mxu1  ;;  %v504_v56 = vadd.f32 %v609_v26, %v424_v54  ;;  %v525_v22 = vpop.permute.xlu1 %524 }
 0x1ee   :  { %v371_v30 = vsel %vm212_vm2, %v369_v25, 0.0  ;;  %v499_v57 = vadd.f32 %v498_v29, %v419_v51 }
 0x1ef   :  { %v363_v31 = vrot.slane %v362_v28, 4  ;;  %v373_v32 = vadd.f32 %v372_v27, %v371_v30  ;;  %v508_v62 = vmul.f32 0.01, %v504_v56  ;;  %v548_v27 = vlaneseq }
 0x1f0   :  { %v507_v0 = vmul.f32 0.01, %v499_v57 }
 0x1f1   :  { %v364_v33 = vadd.f32 %v363_v31, %v362_v28  ;;  %v374_v34 = vrot.slane %v373_v32, 4  ;;  %v510_v6 = vmax.f32 %v504_v56, %v508_v62  ;;  %v549_v30 = vshrl.u32 %v548_v27, 7 }
 0x1f2   :  { %v509_v8 = vmax.f32 %v499_v57, %v507_v0 }
 0x1f3   :  { %v365_v36 = vrot.slane %v364_v33, 2  ;;  %v375_v37 = vadd.f32 %v374_v34, %v373_v32  ;;  %v550_v32 = vsub.s32 0, %v549_v30 }
 0x1f5   :  { %v366_v38 = vadd.f32 %v365_v36, %v364_v33  ;;  %v376_v39 = vrot.slane %v375_v37, 2  ;;  %v546_v33 = vpop.permute.xlu1 %545 }
 0x1f7   :  { %v367_v40 = vrot.slane %v366_v38, 1  ;;  %v377_v41 = vadd.f32 %v376_v39, %v375_v37 }
 0x1f9   :  { %v368_v43 = vadd.f32 %v367_v40, %v366_v38  ;;  %v378_v44 = vrot.slane %v377_v41, 1 }
 0x1fb   :  { %v379_v45 = vadd.f32 %v378_v44, %v377_v41  ;;  %v380_v46 = vmul.f32 0.0625, %v368_v43 }
 0x1fd   :  { %v381_v47 = vmul.f32 0.0625, %v379_v45  ;;  %v382_v48 = vmul.f32 %v380_v46, %v380_v46  ;;  %v384_v49 = vsub.f32 %v352_v21, %v380_v46  ;;  %v385_v50 = vsub.f32 %v357_v19, %v380_v46  ;;  %v530_v21 = vpop.permute.xlu0 %529 }
 0x1ff   :  { %v383_v52 = vsub.f32 %v381_v47, %v382_v48 }
 0x201   :  { %v386_v53 = vadd.f32 1e-05, %v383_v52 }
 0x203   :  { %631 = vrsqrt.f32 %v386_v53 }
 0x20d   :  { %v632_v58 = vpop.eup %631 }
 0x20e   :  { %v388_v59 = vmul.f32 %v632_v58, %v384_v49  ;;  %v389_v60 = vmul.f32 %v632_v58, %v385_v50 }
 0x210   :  { %v401_v61 = vmul.f32 %v398_v42, %v389_v60  ;;  %v400_v63 = vmul.f32 %v393_v35, %v388_v59  ;;  %v551_v35 = vrot.slane %v546_v33, %v550_v32 }
 0x212   :  { %v413_v3 = vadd.f32 %v410_v1, %v401_v61  ;;  %v412_v4 = vadd.f32 %v405_v55, %v400_v63 }
 0x214   :  { %v415_v5 = vmax.f32 %v413_v3, 0.0  ;;  %v414_v7 = vmax.f32 %v412_v4, 0.0 }
 0x216   :  { %v512_v11 = vadd.f32 %v510_v6, %v415_v5  ;;  %v511_v12 = vadd.f32 %v509_v8, %v414_v7 }
 0x218   :  { %v515_v13 = vmul.f32 %v513_v9, %v512_v11  ;;  %v514_v14 = vmul.f32 %v513_v9, %v511_v12 }
 0x21a   :  { %v517_v15 = vadd.f32 %v515_v13, %v822_v10  ;;  %v516_v16 = vadd.f32 %v514_v14, %v820_v2 }
 0x21c   :  { %v519_v17 = vmul.f32 0.01, %v517_v15  ;;  %v518_v18 = vmul.f32 0.01, %v516_v16 }
 0x21e   :  { %v521_v19 = vmax.f32 %v517_v15, %v519_v17  ;;  %v520_v20 = vmax.f32 %v516_v16, %v518_v18 }
 0x220   :  { %v533_v23 = vmul.f32 %v530_v21, %v521_v19  ;;  %v532_v24 = vmul.f32 %v525_v22, %v520_v20 }
 0x222   :  { %v534_v25 = vsel %vm212_vm2, %v532_v24, 0.0  ;;  %v535_v26 = vsel %vm212_vm2, %v533_v23, 0.0 }
 0x223   :  { %v536_v28 = vadd.f32 %v535_v26, %v534_v25 }
 0x225   :  { %v537_v29 = vrot.slane %v536_v28, 4 }
 0x227   :  { %v538_v31 = vadd.f32 %v537_v29, %v536_v28 }
 0x229   :  { %v539_v10 = vrot.slane %v538_v31, 2 }
 0x22b   :  { %v540_v2 = vadd.f32 %v539_v10, %v538_v31 }
 0x22d   :  { %v541_v34 = vrot.slane %v540_v2, 1 }
 0x22f   :  { %v542_v36 = vadd.f32 %v541_v34, %v540_v2 }
 0x231   :  { %v552_v37 = vadd.f32 %v551_v35, %v542_v36 }
 0x233   :  { %554 = vst.msk [vmem:[#allocation4] sm:$0x1] %vm553_vm3, %v552_v37 }
 0x234   :  { %644 = shalt.err (!%p641_p4)
}
 0x235   :  { %s645_s27 = scalar_lea.hbm %s876_s15, 16 }
 0x236   :  { %p646_p5 = scmp.ne.s32.totalorder %s876_s15, %s645_s27  ;;  %p649_p6 = scmp.lt.u32.totalorder %s645_s27, %s876_s15 }
 0x238   :  { %p651_p7 = pnand %p649_p6, %p646_p5 }
 0x23a   :  { %654 = shalt.err (!%p651_p7)
}
 0x23b   :  { %564 = dma.vmem_to_hbm [thread:$0]  %s562_s25, 16, %s876_s15, [#allocation5]  }
 0x23c   :  { %655 = dma.done.wait [#allocation5], 16  }
 0x23d   :  { %656 = vsyncadd [#allocation5], 4294967280 }
 0x23e   :  { %568 = vsyncpa [#allocation5], 1 }

</bundles_post_ra>
